<compile_context>
chip_gen: v6e
topology: v6e:2x2x1
jax: 0.10.0
libtpu: 0.0.40
codegen_flags: <defaults>
</compile_context>

<pallas_src>
import functools

import jax
import jax.numpy as jnp
from jax.experimental import pallas as pl
from jax.experimental.pallas import tpu as pltpu

LANES = 128          # lane width of a vreg
MAX_TILE_ROWS = 512  # up to 512 x 128 = 65536 rays per grid step


def _round_up(a, b):
    return (a + b - 1) // b * b


def _sh_features(x, y, z, degree):
    """Spherical-harmonic basis values for already-normalized x, y, z."""
    xx, yy, zz = x * x, y * y, z * z
    xy, yz, xz = x * y, y * z, x * z
    feats = [jnp.full_like(x, 0.28209479177387814)]
    if degree > 1:
        feats += [-0.48860251190291987 * y,
                   0.48860251190291987 * z,
                  -0.48860251190291987 * x]
    if degree > 2:
        feats += [ 1.0925484305920792 * xy,
                  -1.0925484305920792 * yz,
                   0.31539156525252005 * (2.0 * zz - xx - yy),
                  -1.0925484305920792 * xz,
                   0.5462742152960396 * (xx - yy)]
    if degree > 3:
        feats += [-0.5900435899266435 * y * (3.0 * xx - yy),
                   2.890611442640554 * xy * z,
                  -0.4570457994644658 * y * (4.0 * zz - xx - yy),
                   0.3731763325901154 * z * (2.0 * zz - 3.0 * xx - 3.0 * yy),
                  -0.4570457994644658 * x * (4.0 * zz - xx - yy),
                   1.445305721320277 * z * (xx - yy),
                  -0.5900435899266435 * x * (xx - 3.0 * yy)]
    return feats[: degree * degree]


def _sh_kernel(xyz_ref, out_ref, *, degree):
    """xyz block: (3, TILE_ROWS, 128).  out block: (degree^2, TILE_ROWS, 128)."""
    x = xyz_ref[0].astype(jnp.float32)
    y = xyz_ref[1].astype(jnp.float32)
    z = xyz_ref[2].astype(jnp.float32)

    # F.normalize(dim=-1): v / max(||v||, 1e-12).
    # rsqrt(max(ss, 1e-24)) == 1 / max(sqrt(ss), 1e-12): one EUP op, no divide.
    ss = x * x + y * y + z * z
    inv = jax.lax.rsqrt(jnp.maximum(ss, 1e-24))
    x = x * inv
    y = y * inv
    z = z * inv

    for f, feat in enumerate(_sh_features(x, y, z, degree)):
        out_ref[f] = feat.astype(out_ref.dtype)   # dense (TILE_ROWS, 128) store


def _choose_tile_rows(n_rows8):
    """Largest tile (multiple of 8, <= MAX_TILE_ROWS) with <=~10% padding waste,
    capped so the grid has >= 2 steps when possible (v7x megacore)."""
    if n_rows8 <= 8:
        return 8
    cap = min(MAX_TILE_ROWS, max(8, (n_rows8 // 2) // 8 * 8))
    for tr in (512, 384, 256, 192, 128, 96, 64, 48, 32, 24, 16, 8):
        if tr > cap:
            continue
        if (_round_up(n_rows8, tr) - n_rows8) * 10 <= n_rows8:
            return tr
    return 8


def _sh_encode_slab(d2, degree):
    """d2: (n, 3).  Returns ((degree^2, n_rows_pad, 128) slab, padded ray count)."""
    n = d2.shape[0]
    out_dim = degree * degree

    n_rows = max(-(-n // LANES), 1)
    n_rows8 = _round_up(n_rows, 8)
    tile_rows = _choose_tile_rows(n_rows8)
    n_rows_pad = _round_up(n_rows8, tile_rows)
    n_pad = n_rows_pad * LANES

    # Planar, lane-dense repack: one (3, rows, 128) input => one DMA per step.
    d_pad = jnp.pad(d2, ((0, n_pad - n), (0, 0)))        # padded rays are zero vectors
    planes = d_pad.T.reshape(3, n_rows_pad, LANES)

    kernel = functools.partial(_sh_kernel, degree=degree)
    slab = pl.pallas_call(
        kernel,
        out_shape=jax.ShapeDtypeStruct((out_dim, n_rows_pad, LANES), d2.dtype),
        grid_spec=pltpu.PrefetchScalarGridSpec(
            num_scalar_prefetch=0,
            grid=(n_rows_pad // tile_rows,),
            in_specs=[
                pl.BlockSpec((3, tile_rows, LANES), lambda i: (0, i, 0)),
            ],
            out_specs=pl.BlockSpec((out_dim, tile_rows, LANES),
                                   lambda i: (0, i, 0)),
        ),
        compiler_params=pltpu.CompilerParams(
            dimension_semantics=("parallel",),           # megacore sharding on v7x
            vmem_limit_bytes=32 * 1024 * 1024),
    )(planes)
    return slab, n_pad


@functools.partial(jax.jit, static_argnames=("degree",))
def sh_encode_planar(directions, degree=4):
    """Channel-major SH features, shape (degree^2, prod(batch_dims)).

    Preferred consumption path: a downstream matmul/MLP can contract the
    channel axis from this layout directly, skipping the channel-last
    transpose that `sh_encode` has to pay for module fidelity.
    """
    out_dim = degree * degree
    lead_shape = directions.shape[:-1]
    n = 1
    for s in lead_shape:
        n *= s
    if n == 0:
        return jnp.zeros((out_dim, 0), directions.dtype)
    slab, n_pad = _sh_encode_slab(directions.reshape(n, 3), degree)
    return slab.reshape(out_dim, n_pad)[:, :n]


@functools.partial(jax.jit, static_argnames=("degree",))
def sh_encode(directions, degree=4):
    """JAX/Pallas equivalent of SHEncoder.forward: [..., 3] -> [..., degree^2]."""
    out_dim = degree * degree
    lead_shape = directions.shape[:-1]
    n = 1
    for s in lead_shape:
        n *= s
    if n == 0:
        return jnp.zeros((*lead_shape, out_dim), directions.dtype)

    slab, n_pad = _sh_encode_slab(directions.reshape(n, 3), degree)
    # Module-faithful channel-last layout.  This is the one remaining
    # non-kernel memory pass; callers that can consume channel-major features
    # should use sh_encode_planar() and skip it.
    out = slab.reshape(out_dim, n_pad).T[:n]
    return out.reshape(*lead_shape, out_dim)


def _sh_reference(directions, degree=4):
    """Pure-JAX reference mirroring the PyTorch module."""
    d = directions.astype(jnp.float32)
    norm = jnp.sqrt(jnp.sum(d * d, axis=-1, keepdims=True))
    d = d / jnp.maximum(norm, 1e-12)
    x, y, z = d[..., 0], d[..., 1], d[..., 2]
    return jnp.stack(_sh_features(x, y, z, degree), axis=-1).astype(directions.dtype)


if __name__ == "__main__":
    key = jax.random.PRNGKey(0)
    # [2, 500, 3]: leading batch dims + ragged (non-multiple-of-128) ray count,
    # plus one degenerate zero-direction vector to exercise the normalize clamp.
    directions = jax.random.normal(key, (2, 500, 3), dtype=jnp.float32)
    directions = directions.at[0, 5].set(0.0)

    ref = _sh_reference(directions, degree=4)

    out = jax.block_until_ready(sh_encode(directions, degree=4))
    assert out.shape == (2, 500, 16), out.shape
    assert jnp.allclose(out, ref, rtol=1e-5, atol=1e-5), \
        float(jnp.max(jnp.abs(out - ref)))

    planar = jax.block_until_ready(sh_encode_planar(directions, degree=4))
    assert planar.shape == (16, 1000), planar.shape
    assert jnp.allclose(planar.T.reshape(2, 500, 16), ref, rtol=1e-5, atol=1e-5)

    print("KERNEL_OK")
</pallas_src>

<mosaic_0001>
module attributes {stable_mosaic.version = 11 : i64} {
  func.func @_sh_kernel(%arg0: i32, %arg1: memref<3x8x128xf32, #tpu.memory_space<vmem>>, %arg2: memref<16x8x128xf32, #tpu.memory_space<vmem>>) attributes {dimension_semantics = [#tpu.dimension_semantics<parallel>], iteration_bounds = array<i64: 1>, scalar_prefetch = 0 : i64, scratch_operands = 0 : i64, tpu.core_type = #tpu.core_type<tc>, window_params = [{transform_indices = @transform_0, window_bounds = array<i64: 3, 8, 128>}, {transform_indices = @transform_1, window_bounds = array<i64: 16, 8, 128>}]} {
    %c0 = arith.constant 0 : index
    %c0_0 = arith.constant 0 : index
    %c0_1 = arith.constant 0 : index
    %0 = vector.load %arg1[%c0, %c0_0, %c0_1] : memref<3x8x128xf32, #tpu.memory_space<vmem>>, vector<1x8x128xf32>
    %1 = vector.shape_cast %0 : vector<1x8x128xf32> to vector<8x128xf32>
    %c1 = arith.constant 1 : index
    %c0_2 = arith.constant 0 : index
    %c0_3 = arith.constant 0 : index
    %2 = vector.load %arg1[%c1, %c0_2, %c0_3] : memref<3x8x128xf32, #tpu.memory_space<vmem>>, vector<1x8x128xf32>
    %3 = vector.shape_cast %2 : vector<1x8x128xf32> to vector<8x128xf32>
    %c2 = arith.constant 2 : index
    %c0_4 = arith.constant 0 : index
    %c0_5 = arith.constant 0 : index
    %4 = vector.load %arg1[%c2, %c0_4, %c0_5] : memref<3x8x128xf32, #tpu.memory_space<vmem>>, vector<1x8x128xf32>
    %5 = vector.shape_cast %4 : vector<1x8x128xf32> to vector<8x128xf32>
    %6 = arith.mulf %1, %1 : vector<8x128xf32>
    %7 = arith.mulf %3, %3 : vector<8x128xf32>
    %8 = arith.addf %6, %7 : vector<8x128xf32>
    %9 = arith.mulf %5, %5 : vector<8x128xf32>
    %10 = arith.addf %8, %9 : vector<8x128xf32>
    %cst = arith.constant 1.000000e-24 : f32
    %11 = vector.broadcast %cst : f32 to vector<8x128xf32>
    %12 = arith.maximumf %10, %11 : vector<8x128xf32>
    %13 = math.rsqrt %12 : vector<8x128xf32>
    %14 = arith.mulf %1, %13 : vector<8x128xf32>
    %15 = arith.mulf %3, %13 : vector<8x128xf32>
    %16 = arith.mulf %5, %13 : vector<8x128xf32>
    %17 = arith.mulf %14, %14 : vector<8x128xf32>
    %18 = arith.mulf %15, %15 : vector<8x128xf32>
    %19 = arith.mulf %16, %16 : vector<8x128xf32>
    %20 = arith.mulf %14, %15 : vector<8x128xf32>
    %21 = arith.mulf %15, %16 : vector<8x128xf32>
    %22 = arith.mulf %14, %16 : vector<8x128xf32>
    %cst_6 = arith.constant 0.282094806 : f32
    %23 = vector.broadcast %cst_6 : f32 to vector<8x128xf32>
    %cst_7 = arith.constant -0.488602519 : f32
    %24 = vector.broadcast %cst_7 : f32 to vector<8x128xf32>
    %25 = arith.mulf %24, %15 : vector<8x128xf32>
    %cst_8 = arith.constant 0.488602519 : f32
    %26 = vector.broadcast %cst_8 : f32 to vector<8x128xf32>
    %27 = arith.mulf %26, %16 : vector<8x128xf32>
    %cst_9 = arith.constant -0.488602519 : f32
    %28 = vector.broadcast %cst_9 : f32 to vector<8x128xf32>
    %29 = arith.mulf %28, %14 : vector<8x128xf32>
    %cst_10 = arith.constant 1.09254849 : f32
    %30 = vector.broadcast %cst_10 : f32 to vector<8x128xf32>
    %31 = arith.mulf %30, %20 : vector<8x128xf32>
    %cst_11 = arith.constant -1.09254849 : f32
    %32 = vector.broadcast %cst_11 : f32 to vector<8x128xf32>
    %33 = arith.mulf %32, %21 : vector<8x128xf32>
    %cst_12 = arith.constant 2.000000e+00 : f32
    %34 = vector.broadcast %cst_12 : f32 to vector<8x128xf32>
    %35 = arith.mulf %34, %19 : vector<8x128xf32>
    %36 = arith.subf %35, %17 : vector<8x128xf32>
    %37 = arith.subf %36, %18 : vector<8x128xf32>
    %cst_13 = arith.constant 0.31539157 : f32
    %38 = vector.broadcast %cst_13 : f32 to vector<8x128xf32>
    %39 = arith.mulf %38, %37 : vector<8x128xf32>
    %cst_14 = arith.constant -1.09254849 : f32
    %40 = vector.broadcast %cst_14 : f32 to vector<8x128xf32>
    %41 = arith.mulf %40, %22 : vector<8x128xf32>
    %42 = arith.subf %17, %18 : vector<8x128xf32>
    %cst_15 = arith.constant 0.546274245 : f32
    %43 = vector.broadcast %cst_15 : f32 to vector<8x128xf32>
    %44 = arith.mulf %43, %42 : vector<8x128xf32>
    %cst_16 = arith.constant -0.590043604 : f32
    %45 = vector.broadcast %cst_16 : f32 to vector<8x128xf32>
    %46 = arith.mulf %45, %15 : vector<8x128xf32>
    %cst_17 = arith.constant 3.000000e+00 : f32
    %47 = vector.broadcast %cst_17 : f32 to vector<8x128xf32>
    %48 = arith.mulf %47, %17 : vector<8x128xf32>
    %49 = arith.subf %48, %18 : vector<8x128xf32>
    %50 = arith.mulf %46, %49 : vector<8x128xf32>
    %cst_18 = arith.constant 2.89061141 : f32
    %51 = vector.broadcast %cst_18 : f32 to vector<8x128xf32>
    %52 = arith.mulf %51, %20 : vector<8x128xf32>
    %53 = arith.mulf %52, %16 : vector<8x128xf32>
    %cst_19 = arith.constant -0.457045794 : f32
    %54 = vector.broadcast %cst_19 : f32 to vector<8x128xf32>
    %55 = arith.mulf %54, %15 : vector<8x128xf32>
    %cst_20 = arith.constant 4.000000e+00 : f32
    %56 = vector.broadcast %cst_20 : f32 to vector<8x128xf32>
    %57 = arith.mulf %56, %19 : vector<8x128xf32>
    %58 = arith.subf %57, %17 : vector<8x128xf32>
    %59 = arith.subf %58, %18 : vector<8x128xf32>
    %60 = arith.mulf %55, %59 : vector<8x128xf32>
    %cst_21 = arith.constant 0.373176336 : f32
    %61 = vector.broadcast %cst_21 : f32 to vector<8x128xf32>
    %62 = arith.mulf %61, %16 : vector<8x128xf32>
    %cst_22 = arith.constant 2.000000e+00 : f32
    %63 = vector.broadcast %cst_22 : f32 to vector<8x128xf32>
    %64 = arith.mulf %63, %19 : vector<8x128xf32>
    %cst_23 = arith.constant 3.000000e+00 : f32
    %65 = vector.broadcast %cst_23 : f32 to vector<8x128xf32>
    %66 = arith.mulf %65, %17 : vector<8x128xf32>
    %67 = arith.subf %64, %66 : vector<8x128xf32>
    %cst_24 = arith.constant 3.000000e+00 : f32
    %68 = vector.broadcast %cst_24 : f32 to vector<8x128xf32>
    %69 = arith.mulf %68, %18 : vector<8x128xf32>
    %70 = arith.subf %67, %69 : vector<8x128xf32>
    %71 = arith.mulf %62, %70 : vector<8x128xf32>
    %cst_25 = arith.constant -0.457045794 : f32
    %72 = vector.broadcast %cst_25 : f32 to vector<8x128xf32>
    %73 = arith.mulf %72, %14 : vector<8x128xf32>
    %cst_26 = arith.constant 4.000000e+00 : f32
    %74 = vector.broadcast %cst_26 : f32 to vector<8x128xf32>
    %75 = arith.mulf %74, %19 : vector<8x128xf32>
    %76 = arith.subf %75, %17 : vector<8x128xf32>
    %77 = arith.subf %76, %18 : vector<8x128xf32>
    %78 = arith.mulf %73, %77 : vector<8x128xf32>
    %cst_27 = arith.constant 1.44530571 : f32
    %79 = vector.broadcast %cst_27 : f32 to vector<8x128xf32>
    %80 = arith.mulf %79, %16 : vector<8x128xf32>
    %81 = arith.subf %17, %18 : vector<8x128xf32>
    %82 = arith.mulf %80, %81 : vector<8x128xf32>
    %cst_28 = arith.constant -0.590043604 : f32
    %83 = vector.broadcast %cst_28 : f32 to vector<8x128xf32>
    %84 = arith.mulf %83, %14 : vector<8x128xf32>
    %cst_29 = arith.constant 3.000000e+00 : f32
    %85 = vector.broadcast %cst_29 : f32 to vector<8x128xf32>
    %86 = arith.mulf %85, %18 : vector<8x128xf32>
    %87 = arith.subf %17, %86 : vector<8x128xf32>
    %88 = arith.mulf %84, %87 : vector<8x128xf32>
    %c0_30 = arith.constant 0 : index
    %c0_31 = arith.constant 0 : index
    %c0_32 = arith.constant 0 : index
    %89 = vector.load %arg2[%c0_30, %c0_31, %c0_32] : memref<16x8x128xf32, #tpu.memory_space<vmem>>, vector<1x8x128xf32>
    %90 = vector.shape_cast %89 : vector<1x8x128xf32> to vector<8x128xf32>
    %91 = vector.shape_cast %23 : vector<8x128xf32> to vector<1x8x128xf32>
    tpu.vector_store %arg2[%c0_30, %c0_31, %c0_32], %91 {strides = array<i32>} : memref<16x8x128xf32, #tpu.memory_space<vmem>>, vector<1x8x128xf32>,
    %c1_33 = arith.constant 1 : index
    %c0_34 = arith.constant 0 : index
    %c0_35 = arith.constant 0 : index
    %92 = vector.load %arg2[%c1_33, %c0_34, %c0_35] : memref<16x8x128xf32, #tpu.memory_space<vmem>>, vector<1x8x128xf32>
    %93 = vector.shape_cast %92 : vector<1x8x128xf32> to vector<8x128xf32>
    %94 = vector.shape_cast %25 : vector<8x128xf32> to vector<1x8x128xf32>
    tpu.vector_store %arg2[%c1_33, %c0_34, %c0_35], %94 {strides = array<i32>} : memref<16x8x128xf32, #tpu.memory_space<vmem>>, vector<1x8x128xf32>,
    %c2_36 = arith.constant 2 : index
    %c0_37 = arith.constant 0 : index
    %c0_38 = arith.constant 0 : index
    %95 = vector.load %arg2[%c2_36, %c0_37, %c0_38] : memref<16x8x128xf32, #tpu.memory_space<vmem>>, vector<1x8x128xf32>
    %96 = vector.shape_cast %95 : vector<1x8x128xf32> to vector<8x128xf32>
    %97 = vector.shape_cast %27 : vector<8x128xf32> to vector<1x8x128xf32>
    tpu.vector_store %arg2[%c2_36, %c0_37, %c0_38], %97 {strides = array<i32>} : memref<16x8x128xf32, #tpu.memory_space<vmem>>, vector<1x8x128xf32>,
    %c3 = arith.constant 3 : index
    %c0_39 = arith.constant 0 : index
    %c0_40 = arith.constant 0 : index
    %98 = vector.load %arg2[%c3, %c0_39, %c0_40] : memref<16x8x128xf32, #tpu.memory_space<vmem>>, vector<1x8x128xf32>
    %99 = vector.shape_cast %98 : vector<1x8x128xf32> to vector<8x128xf32>
    %100 = vector.shape_cast %29 : vector<8x128xf32> to vector<1x8x128xf32>
    tpu.vector_store %arg2[%c3, %c0_39, %c0_40], %100 {strides = array<i32>} : memref<16x8x128xf32, #tpu.memory_space<vmem>>, vector<1x8x128xf32>,
    %c4 = arith.constant 4 : index
    %c0_41 = arith.constant 0 : index
    %c0_42 = arith.constant 0 : index
    %101 = vector.load %arg2[%c4, %c0_41, %c0_42] : memref<16x8x128xf32, #tpu.memory_space<vmem>>, vector<1x8x128xf32>
    %102 = vector.shape_cast %101 : vector<1x8x128xf32> to vector<8x128xf32>
    %103 = vector.shape_cast %31 : vector<8x128xf32> to vector<1x8x128xf32>
    tpu.vector_store %arg2[%c4, %c0_41, %c0_42], %103 {strides = array<i32>} : memref<16x8x128xf32, #tpu.memory_space<vmem>>, vector<1x8x128xf32>,
    %c5 = arith.constant 5 : index
    %c0_43 = arith.constant 0 : index
    %c0_44 = arith.constant 0 : index
    %104 = vector.load %arg2[%c5, %c0_43, %c0_44] : memref<16x8x128xf32, #tpu.memory_space<vmem>>, vector<1x8x128xf32>
    %105 = vector.shape_cast %104 : vector<1x8x128xf32> to vector<8x128xf32>
    %106 = vector.shape_cast %33 : vector<8x128xf32> to vector<1x8x128xf32>
    tpu.vector_store %arg2[%c5, %c0_43, %c0_44], %106 {strides = array<i32>} : memref<16x8x128xf32, #tpu.memory_space<vmem>>, vector<1x8x128xf32>,
    %c6 = arith.constant 6 : index
    %c0_45 = arith.constant 0 : index
    %c0_46 = arith.constant 0 : index
    %107 = vector.load %arg2[%c6, %c0_45, %c0_46] : memref<16x8x128xf32, #tpu.memory_space<vmem>>, vector<1x8x128xf32>
    %108 = vector.shape_cast %107 : vector<1x8x128xf32> to vector<8x128xf32>
    %109 = vector.shape_cast %39 : vector<8x128xf32> to vector<1x8x128xf32>
    tpu.vector_store %arg2[%c6, %c0_45, %c0_46], %109 {strides = array<i32>} : memref<16x8x128xf32, #tpu.memory_space<vmem>>, vector<1x8x128xf32>,
    %c7 = arith.constant 7 : index
    %c0_47 = arith.constant 0 : index
    %c0_48 = arith.constant 0 : index
    %110 = vector.load %arg2[%c7, %c0_47, %c0_48] : memref<16x8x128xf32, #tpu.memory_space<vmem>>, vector<1x8x128xf32>
    %111 = vector.shape_cast %110 : vector<1x8x128xf32> to vector<8x128xf32>
    %112 = vector.shape_cast %41 : vector<8x128xf32> to vector<1x8x128xf32>
    tpu.vector_store %arg2[%c7, %c0_47, %c0_48], %112 {strides = array<i32>} : memref<16x8x128xf32, #tpu.memory_space<vmem>>, vector<1x8x128xf32>,
    %c8 = arith.constant 8 : index
    %c0_49 = arith.constant 0 : index
    %c0_50 = arith.constant 0 : index
    %113 = vector.load %arg2[%c8, %c0_49, %c0_50] : memref<16x8x128xf32, #tpu.memory_space<vmem>>, vector<1x8x128xf32>
    %114 = vector.shape_cast %113 : vector<1x8x128xf32> to vector<8x128xf32>
    %115 = vector.shape_cast %44 : vector<8x128xf32> to vector<1x8x128xf32>
    tpu.vector_store %arg2[%c8, %c0_49, %c0_50], %115 {strides = array<i32>} : memref<16x8x128xf32, #tpu.memory_space<vmem>>, vector<1x8x128xf32>,
    %c9 = arith.constant 9 : index
    %c0_51 = arith.constant 0 : index
    %c0_52 = arith.constant 0 : index
    %116 = vector.load %arg2[%c9, %c0_51, %c0_52] : memref<16x8x128xf32, #tpu.memory_space<vmem>>, vector<1x8x128xf32>
    %117 = vector.shape_cast %116 : vector<1x8x128xf32> to vector<8x128xf32>
    %118 = vector.shape_cast %50 : vector<8x128xf32> to vector<1x8x128xf32>
    tpu.vector_store %arg2[%c9, %c0_51, %c0_52], %118 {strides = array<i32>} : memref<16x8x128xf32, #tpu.memory_space<vmem>>, vector<1x8x128xf32>,
    %c10 = arith.constant 10 : index
    %c0_53 = arith.constant 0 : index
    %c0_54 = arith.constant 0 : index
    %119 = vector.load %arg2[%c10, %c0_53, %c0_54] : memref<16x8x128xf32, #tpu.memory_space<vmem>>, vector<1x8x128xf32>
    %120 = vector.shape_cast %119 : vector<1x8x128xf32> to vector<8x128xf32>
    %121 = vector.shape_cast %53 : vector<8x128xf32> to vector<1x8x128xf32>
    tpu.vector_store %arg2[%c10, %c0_53, %c0_54], %121 {strides = array<i32>} : memref<16x8x128xf32, #tpu.memory_space<vmem>>, vector<1x8x128xf32>,
    %c11 = arith.constant 11 : index
    %c0_55 = arith.constant 0 : index
    %c0_56 = arith.constant 0 : index
    %122 = vector.load %arg2[%c11, %c0_55, %c0_56] : memref<16x8x128xf32, #tpu.memory_space<vmem>>, vector<1x8x128xf32>
    %123 = vector.shape_cast %122 : vector<1x8x128xf32> to vector<8x128xf32>
    %124 = vector.shape_cast %60 : vector<8x128xf32> to vector<1x8x128xf32>
    tpu.vector_store %arg2[%c11, %c0_55, %c0_56], %124 {strides = array<i32>} : memref<16x8x128xf32, #tpu.memory_space<vmem>>, vector<1x8x128xf32>,
    %c12 = arith.constant 12 : index
    %c0_57 = arith.constant 0 : index
    %c0_58 = arith.constant 0 : index
    %125 = vector.load %arg2[%c12, %c0_57, %c0_58] : memref<16x8x128xf32, #tpu.memory_space<vmem>>, vector<1x8x128xf32>
    %126 = vector.shape_cast %125 : vector<1x8x128xf32> to vector<8x128xf32>
    %127 = vector.shape_cast %71 : vector<8x128xf32> to vector<1x8x128xf32>
    tpu.vector_store %arg2[%c12, %c0_57, %c0_58], %127 {strides = array<i32>} : memref<16x8x128xf32, #tpu.memory_space<vmem>>, vector<1x8x128xf32>,
    %c13 = arith.constant 13 : index
    %c0_59 = arith.constant 0 : index
    %c0_60 = arith.constant 0 : index
    %128 = vector.load %arg2[%c13, %c0_59, %c0_60] : memref<16x8x128xf32, #tpu.memory_space<vmem>>, vector<1x8x128xf32>
    %129 = vector.shape_cast %128 : vector<1x8x128xf32> to vector<8x128xf32>
    %130 = vector.shape_cast %78 : vector<8x128xf32> to vector<1x8x128xf32>
    tpu.vector_store %arg2[%c13, %c0_59, %c0_60], %130 {strides = array<i32>} : memref<16x8x128xf32, #tpu.memory_space<vmem>>, vector<1x8x128xf32>,
    %c14 = arith.constant 14 : index
    %c0_61 = arith.constant 0 : index
    %c0_62 = arith.constant 0 : index
    %131 = vector.load %arg2[%c14, %c0_61, %c0_62] : memref<16x8x128xf32, #tpu.memory_space<vmem>>, vector<1x8x128xf32>
    %132 = vector.shape_cast %131 : vector<1x8x128xf32> to vector<8x128xf32>
    %133 = vector.shape_cast %82 : vector<8x128xf32> to vector<1x8x128xf32>
    tpu.vector_store %arg2[%c14, %c0_61, %c0_62], %133 {strides = array<i32>} : memref<16x8x128xf32, #tpu.memory_space<vmem>>, vector<1x8x128xf32>,
    %c15 = arith.constant 15 : index
    %c0_63 = arith.constant 0 : index
    %c0_64 = arith.constant 0 : index
    %134 = vector.load %arg2[%c15, %c0_63, %c0_64] : memref<16x8x128xf32, #tpu.memory_space<vmem>>, vector<1x8x128xf32>
    %135 = vector.shape_cast %134 : vector<1x8x128xf32> to vector<8x128xf32>
    %136 = vector.shape_cast %88 : vector<8x128xf32> to vector<1x8x128xf32>
    tpu.vector_store %arg2[%c15, %c0_63, %c0_64], %136 {strides = array<i32>} : memref<16x8x128xf32, #tpu.memory_space<vmem>>, vector<1x8x128xf32>,
    return
  }
  func.func @transform_0(%arg0: i32) -> (i32, i32, i32) {
    %c0_i32 = arith.constant 0 : i32
    %c0_i32_0 = arith.constant 0 : i32
    %c0_i32_1 = arith.constant 0 : i32
    return %c0_i32, %arg0, %c0_i32_0 : i32, i32, i32
  }
  func.func @transform_1(%arg0: i32) -> (i32, i32, i32) {
    %c0_i32 = arith.constant 0 : i32
    %c0_i32_0 = arith.constant 0 : i32
    %c0_i32_1 = arith.constant 0 : i32
    return %c0_i32, %arg0, %c0_i32_0 : i32, i32, i32
  }
}

</mosaic_0001>

<bundles_post_ra>
// kernel: sh_encode.1
= control target key start
LH: loop header
LB: loop body
LE: loop exit
PB: predicated region body
PF: predicated region fallthrough
CT: control target
= control target key end

     0   :  { %v119_v0 = vmov 0.2820948   ;;  %s187_s1 = inlined_call_operand.vmem [shape: f32[16,8,128], index: 1, kind: output, shape index: {}]   ;;  %s188_s0 = inlined_call_operand.vmem [shape: f32[3,8,128], index: 0, kind: input, shape index: {}]  }
   0x1   :  { %64 = vst [vmem:[%s187_s1] sm:$0xff] %v119_v0  ;;  %v8_v1 = vld [vmem:[%s188_s0] sm:$0xff]  ;;  %v99_v2 = vld [vmem:[%s188_s0 + $0x8] sm:$0xff]  ;;  %v100_v3 = vld [vmem:[%s188_s0 + $0x10] sm:$0xff] }
   0x2   :  { %v13_v4 = vmul.f32 %v8_v1, %v8_v1  ;;  %v14_v5 = vmul.f32 %v99_v2, %v99_v2  ;;  %v16_v6 = vmul.f32 %v100_v3, %v100_v3 }
   0x4   :  { %v15_v7 = vadd.f32 %v14_v5, %v13_v4 }
   0x6   :  { %v17_v8 = vadd.f32 %v16_v6, %v15_v7 }
   0x8   :  { %v18_v9 = vmax.f32 %v17_v8, 1e-24 }
   0xa   :  { %117 = vrsqrt.f32 %v18_v9 }
  0x17   :  { %v118_v10 = vpop.eup %117 }
  0x18   :  { %v21_v11 = vmul.f32 %v118_v10, %v99_v2  ;;  %v22_v12 = vmul.f32 %v118_v10, %v100_v3  ;;  %v20_v13 = vmul.f32 %v118_v10, %v8_v1 }
  0x1a   :  { %v29_v14 = vmul.f32 -0.48860252, %v21_v11  ;;  %v30_v15 = vmul.f32 0.48860252, %v22_v12  ;;  %v31_v16 = vmul.f32 -0.48860252, %v20_v13  ;;  %v26_v17 = vmul.f32 %v21_v11, %v20_v13 }
  0x1b   :  { %v27_v18 = vmul.f32 %v22_v12, %v21_v11  ;;  %v23_v19 = vmul.f32 %v20_v13, %v20_v13  ;;  %v24_v20 = vmul.f32 %v21_v11, %v21_v11  ;;  %v25_v21 = vmul.f32 %v22_v12, %v22_v12 }
  0x1c   :  { %101 = vst [vmem:[%s187_s1 + $0x8] sm:$0xff] %v29_v14  ;;  %102 = vst [vmem:[%s187_s1 + $0x10] sm:$0xff] %v30_v15  ;;  %v32_v22 = vmul.f32 1.0925485, %v26_v17  ;;  %v28_v23 = vmul.f32 %v22_v12, %v20_v13  ;;  %v41_v24 = vmul.f32 -0.5900436, %v21_v11 }
  0x1d   :  { %103 = vst [vmem:[%s187_s1 + $0x18] sm:$0xff] %v31_v16  ;;  %v45_v25 = vmul.f32 2.8906114, %v26_v17  ;;  %v33_v26 = vmul.f32 -1.0925485, %v27_v18  ;;  %v34_v27 = vmul.f32 2.0, %v25_v21  ;;  %v39_v28 = vsub.f32 %v23_v19, %v24_v20 }
  0x1e   :  { %v42_v29 = vmul.f32 3.0, %v23_v19  ;;  %104 = vst [vmem:[%s187_s1 + $0x20] sm:$0xff] %v32_v22  ;;  %v38_v30 = vmul.f32 -1.0925485, %v28_v23  ;;  %v47_v32 = vmul.f32 -0.4570458, %v21_v11 }
  0x1f   :  { %v46_v31 = vmul.f32 %v45_v25, %v22_v12  ;;  %v48_v33 = vmul.f32 4.0, %v25_v21  ;;  %105 = vst [vmem:[%s187_s1 + $0x28] sm:$0xff] %v33_v26  ;;  %v35_v34 = vsub.f32 %v34_v27, %v23_v19  ;;  %v40_v35 = vmul.f32 0.54627424, %v39_v28 }
  0x20   :  { %v43_v36 = vsub.f32 %v42_v29, %v24_v20  ;;  %v52_v37 = vmul.f32 0.37317634, %v22_v12  ;;  %107 = vst [vmem:[%s187_s1 + $0x38] sm:$0xff] %v38_v30  ;;  %v53_v39 = vsub.f32 %v34_v27, %v42_v29  ;;  %v54_v40 = vmul.f32 3.0, %v24_v20 }
  0x21   :  { %110 = vst [vmem:[%s187_s1 + $0x50] sm:$0xff] %v46_v31  ;;  %v49_v38 = vsub.f32 %v48_v33, %v23_v19  ;;  %v57_v41 = vmul.f32 -0.4570458, %v20_v13  ;;  %v36_v42 = vsub.f32 %v35_v34, %v24_v20  ;;  %108 = vst [vmem:[%s187_s1 + $0x40] sm:$0xff] %v40_v35  ;;  %v59_v44 = vmul.f32 1.4453057, %v22_v12 }
  0x22   :  { %v44_v43 = vmul.f32 %v43_v36, %v41_v24  ;;  %v61_v45 = vmul.f32 -0.5900436, %v20_v13  ;;  %v55_v47 = vsub.f32 %v53_v39, %v54_v40  ;;  %v62_v48 = vsub.f32 %v23_v19, %v54_v40 }
  0x23   :  { %v50_v46 = vsub.f32 %v49_v38, %v24_v20  ;;  %v37_v49 = vmul.f32 0.31539157, %v36_v42  ;;  %v60_v50 = vmul.f32 %v59_v44, %v39_v28 }
  0x24   :  { %109 = vst [vmem:[%s187_s1 + $0x48] sm:$0xff] %v44_v43  ;;  %v56_v52 = vmul.f32 %v55_v47, %v52_v37  ;;  %v63_v54 = vmul.f32 %v62_v48, %v61_v45 }
  0x25   :  { %v51_v51 = vmul.f32 %v50_v46, %v47_v32  ;;  %v58_v53 = vmul.f32 %v57_v41, %v50_v46  ;;  %106 = vst [vmem:[%s187_s1 + $0x30] sm:$0xff] %v37_v49  ;;  %114 = vst [vmem:[%s187_s1 + $0x70] sm:$0xff] %v60_v50 }
  0x26   :  { %112 = vst [vmem:[%s187_s1 + $0x60] sm:$0xff] %v56_v52  ;;  %115 = vst [vmem:[%s187_s1 + $0x78] sm:$0xff] %v63_v54 }
  0x27   :  { %111 = vst [vmem:[%s187_s1 + $0x58] sm:$0xff] %v51_v51  ;;  %113 = vst [vmem:[%s187_s1 + $0x68] sm:$0xff] %v58_v53 }

</bundles_post_ra>
